<compile_context>
chip_gen: v7x
topology: tpu7x:2x2x1
jax: 0.10.0
libtpu: 0.0.40
codegen_flags: <defaults>
</compile_context>

<pallas_src>
import functools
import math

import jax
import jax.numpy as jnp
from jax import lax
from jax.experimental import pallas as pl
from jax.experimental.pallas import tpu as pltpu
import numpy as np


# ----------------------------------------------------------------------------
# Pass 1: fused Q|K|V projection, tiled over (large) node tiles.
# ----------------------------------------------------------------------------
def _qkv_proj_kernel(x_ref, w_ref, b_ref, q_ref, kv_ref, *, hd):
  qkv = jnp.dot(x_ref[...], w_ref[...],
                preferred_element_type=jnp.float32) + b_ref[...]
  q_ref[...] = qkv[:, :hd].astype(q_ref.dtype)
  kv_ref[...] = qkv[:, hd:].astype(kv_ref.dtype)           # [K | V]


# ----------------------------------------------------------------------------
# Pass 2: per-edge gather + score -> payload [msg | score], edge-tiled only.
# ----------------------------------------------------------------------------
def _edge_payload_kernel(src_ref, dst_ref, ea_ref, we_ref, be_ref, bsum_ref,
                         q_ref, kv_ref, payload_ref, *, hd, onehot_dtype):
  te = src_ref.shape[0]
  n_pad = kv_ref.shape[0]

  # Edge projection (We/be already scaled by 1/sqrt(head_dim)): VPU broadcast.
  e_p = ea_ref[...] * we_ref[...] + be_ref[...]                     # (TE, HD)

  # One-hot gathers on the MXU -- done once per edge, not once per node tile.
  node_iota = lax.broadcasted_iota(jnp.int32, (te, n_pad), 1)
  src_oh = (src_ref[...] == node_iota).astype(onehot_dtype)         # (TE, Np)
  dst_oh = (dst_ref[...] == node_iota).astype(onehot_dtype)         # (TE, Np)

  kv_src = jnp.dot(src_oh, kv_ref[...],
                   preferred_element_type=jnp.float32)              # (TE, 2HD)
  q_dst = jnp.dot(dst_oh, q_ref[...],
                  preferred_element_type=jnp.float32)               # (TE, HD)

  # Per-edge, per-head score; per-head sum + broadcast via the constant
  # block-diagonal matrix (built once in the wrapper, constant index_map).
  s = kv_src[:, :hd] * q_dst * e_p                                  # (TE, HD)
  s_sum = jnp.dot(s, bsum_ref[...], preferred_element_type=jnp.float32)
  score = jnp.exp(jnp.clip(s_sum, -5.0, 5.0))                       # (TE, HD)

  msg = kv_src[:, hd:] * score                                      # (TE, HD)
  payload_ref[...] = jnp.concatenate(
      [msg, score], axis=-1).astype(payload_ref.dtype)              # (TE, 2HD)


# ----------------------------------------------------------------------------
# Pass 3: scatter-add, grid (node_tiles x edge_tiles), dst-sorted + skipping.
# ----------------------------------------------------------------------------
def _scatter_kernel(lo_ref, hi_ref, dst_row_ref, payload_ref, out_ref, acc_ref,
                    *, hd, onehot_dtype):
  i = pl.program_id(0)                     # node-tile index (parallel, outer)
  k = pl.program_id(1)                     # edge-tile index (reduction, inner)
  tn = out_ref.shape[0]
  te = payload_ref.shape[0]
  tile_start = i * tn

  @pl.when(k == 0)
  def _init():
    acc_ref[...] = jnp.zeros_like(acc_ref)

  # Edges are sorted by dst, so edge tile k only touches dst in [lo, hi].
  lo = lo_ref[k]
  hi = hi_ref[k]

  @pl.when(jnp.logical_and(hi >= tile_start, lo < tile_start + tn))
  def _scatter():
    dst_row = dst_row_ref[...]                                      # (1, TE)
    row_iota = lax.broadcasted_iota(jnp.int32, (tn, te), 0) + tile_start
    dst_oh_t = (row_iota == dst_row).astype(onehot_dtype)           # (TN, TE)
    acc_ref[...] += jnp.dot(dst_oh_t, payload_ref[...],
                            preferred_element_type=jnp.float32)     # (TN, 2HD)

  @pl.when(k == pl.num_programs(1) - 1)
  def _finalize():
    wv = acc_ref[:, :hd]
    z = acc_ref[:, hd:]
    out_ref[...] = wv * pl.reciprocal(z + 1e-6, approx=True)


# ----------------------------------------------------------------------------
# Wrapper: padding, sorting, fused / pre-scaled weights, three pallas_calls.
# ----------------------------------------------------------------------------
def _round_up(v, m):
  return ((v + m - 1) // m) * m


def _pad_rows(a, target, value=0):
  pad = target - a.shape[0]
  if pad:
    widths = ((0, pad),) + ((0, 0),) * (a.ndim - 1)
    a = jnp.pad(a, widths, constant_values=value)
  return a


def _vmem_limit(block_bytes, headroom=8 << 20):
  """Scoped-VMEM request from actual block sizes (x2 for double-buffering)."""
  need = 2 * sum(block_bytes) + headroom
  return int(min(128 << 20, max(32 << 20, need)))


def exphormer_attention(x, expander_edge_index, expander_edge_attr,
                        virt_h, virt_edge_index, virt_edge_attr, params, *,
                        num_heads, head_dim, use_virt_nodes=False,
                        tile_nodes=128, tile_edges=256, proj_tile_nodes=256,
                        use_bf16_gather=True):
  # Tile guidance (review): v5e -> tile_nodes/tile_edges = 128/128;
  # v6e/v7x -> 128-256/256 (keep n_tiles >= 2 on v7x for the 2 TensorCores).
  hd = num_heads * head_dim
  gather_dtype = jnp.bfloat16 if use_bf16_gather else jnp.float32
  gd_bytes = jnp.dtype(gather_dtype).itemsize

  h = x.astype(jnp.float32)
  edge_index = expander_edge_index
  edge_attr = expander_edge_attr
  if use_virt_nodes:
    h = jnp.concatenate([h, virt_h.astype(jnp.float32)], axis=0)
    edge_index = jnp.concatenate([edge_index, virt_edge_index], axis=1)
    edge_attr = jnp.concatenate([edge_attr, virt_edge_attr], axis=0)
  num_node = x.shape[0]            # module returns only real-node rows
  n = h.shape[0]
  in_dim = h.shape[1]

  # Pass-1 tile is a multiple of tile_nodes so a single node padding works
  # for both pass 1 and pass 3.
  proj_tile = max(tile_nodes, (proj_tile_nodes // tile_nodes) * tile_nodes)
  n_pad = _round_up(max(n, proj_tile), proj_tile)
  x_p = _pad_rows(h, n_pad)

  # ---- edges: pad, then sort by destination (enables pass-3 tile skip) ----
  src = edge_index[0].astype(jnp.int32)
  dst = edge_index[1].astype(jnp.int32)
  ea = edge_attr.astype(jnp.float32).reshape(-1, 1)
  n_edges = src.shape[0]
  e_pad = _round_up(max(n_edges, tile_edges), tile_edges)
  pad_e = e_pad - n_edges
  if pad_e:
    src = jnp.concatenate([src, jnp.zeros((pad_e,), jnp.int32)])
    # sentinel dst == n_pad never matches any node row -> padded edges are
    # zeroed by the scatter one-hot (and sort to the end).
    dst = jnp.concatenate([dst, jnp.full((pad_e,), n_pad, jnp.int32)])
    ea = jnp.concatenate([ea, jnp.zeros((pad_e, 1), jnp.float32)])
  order = jnp.argsort(dst)
  src, dst, ea = src[order], dst[order], ea[order]

  n_tiles = n_pad // tile_nodes
  e_tiles = e_pad // tile_edges
  proj_tiles = n_pad // proj_tile

  dst_2d = dst.reshape(e_tiles, tile_edges)
  tile_lo = dst_2d.min(axis=1).astype(jnp.int32)     # (e_tiles,) SMEM prefetch
  tile_hi = dst_2d.max(axis=1).astype(jnp.int32)

  src_col = src.reshape(e_pad, 1)
  dst_col = dst.reshape(e_pad, 1)
  dst_row = dst.reshape(1, e_pad)

  # ---- fused / pre-scaled weights ----------------------------------------
  w_qkv = jnp.concatenate([params["Wq"], params["Wk"], params["Wv"]], axis=1)
  b_qkv = jnp.concatenate([params["bq"], params["bk"], params["bv"]], axis=1)
  inv_sqrt_d = 1.0 / math.sqrt(head_dim)
  we_s = (params["We"] * inv_sqrt_d).astype(jnp.float32).reshape(1, hd)
  be_s = (params["be"] * inv_sqrt_d).astype(jnp.float32).reshape(1, hd)

  head_of = jnp.arange(hd, dtype=jnp.int32) // head_dim
  bsum = (head_of[:, None] == head_of[None, :]).astype(jnp.float32)  # (HD,HD)

  # ---- pass 1: fused QKV projection ---------------------------------------
  q_h, kv_h = pl.pallas_call(
      functools.partial(_qkv_proj_kernel, hd=hd),
      grid=(proj_tiles,),
      in_specs=[
          pl.BlockSpec((proj_tile, in_dim), lambda i: (i, 0)),
          pl.BlockSpec((in_dim, 3 * hd), lambda i: (0, 0)),
          pl.BlockSpec((1, 3 * hd), lambda i: (0, 0)),
      ],
      out_specs=(
          pl.BlockSpec((proj_tile, hd), lambda i: (i, 0)),
          pl.BlockSpec((proj_tile, 2 * hd), lambda i: (i, 0)),
      ),
      out_shape=(
          jax.ShapeDtypeStruct((n_pad, hd), gather_dtype),
          jax.ShapeDtypeStruct((n_pad, 2 * hd), gather_dtype),
      ),
      compiler_params=pltpu.CompilerParams(
          dimension_semantics=("parallel",)),
  )(x_p, w_qkv, b_qkv)

  # ---- pass 2: per-edge gather + score -> payload [msg | score] -----------
  pass2_blocks = [
      3 * tile_edges * 4,                         # src, dst, ea
      2 * hd * 4,                                 # We, be
      hd * hd * 4,                                # bsum (constant)
      n_pad * hd * gd_bytes,                      # Q (all nodes)
      n_pad * 2 * hd * gd_bytes,                  # K|V (all nodes)
      tile_edges * 2 * hd * gd_bytes,             # payload out
  ]
  payload = pl.pallas_call(
      functools.partial(_edge_payload_kernel, hd=hd,
                        onehot_dtype=gather_dtype),
      grid=(e_tiles,),
      in_specs=[
          pl.BlockSpec((tile_edges, 1), lambda k: (k, 0)),    # src
          pl.BlockSpec((tile_edges, 1), lambda k: (k, 0)),    # dst
          pl.BlockSpec((tile_edges, 1), lambda k: (k, 0)),    # edge attr
          pl.BlockSpec((1, hd), lambda k: (0, 0)),            # We (scaled)
          pl.BlockSpec((1, hd), lambda k: (0, 0)),            # be (scaled)
          pl.BlockSpec((hd, hd), lambda k: (0, 0)),           # bsum
          pl.BlockSpec((n_pad, hd), lambda k: (0, 0)),        # Q all nodes
          pl.BlockSpec((n_pad, 2 * hd), lambda k: (0, 0)),    # K|V all nodes
      ],
      out_specs=pl.BlockSpec((tile_edges, 2 * hd), lambda k: (k, 0)),
      out_shape=jax.ShapeDtypeStruct((e_pad, 2 * hd), gather_dtype),
      compiler_params=pltpu.CompilerParams(
          dimension_semantics=("parallel",),
          vmem_limit_bytes=_vmem_limit(pass2_blocks)),
  )(src_col, dst_col, ea, we_s, be_s, bsum, q_h, kv_h)

  # ---- pass 3: dst-sorted scatter-add with SMEM tile-range skipping -------
  pass3_blocks = [
      tile_edges * 4,                             # dst_row
      tile_edges * 2 * hd * gd_bytes,             # payload block
      tile_nodes * hd * 4,                        # output block
      tile_nodes * 2 * hd * 4,                    # accumulator scratch
  ]
  out_pad = pl.pallas_call(
      functools.partial(_scatter_kernel, hd=hd, onehot_dtype=gather_dtype),
      grid_spec=pltpu.PrefetchScalarGridSpec(
          num_scalar_prefetch=2,
          grid=(n_tiles, e_tiles),
          in_specs=[
              pl.BlockSpec((1, tile_edges), lambda i, k, lo, hi: (0, k)),
              pl.BlockSpec((tile_edges, 2 * hd), lambda i, k, lo, hi: (k, 0)),
          ],
          out_specs=pl.BlockSpec((tile_nodes, hd),
                                 lambda i, k, lo, hi: (i, 0)),
          scratch_shapes=[pltpu.VMEM((tile_nodes, 2 * hd), jnp.float32)]),
      out_shape=jax.ShapeDtypeStruct((n_pad, hd), jnp.float32),
      compiler_params=pltpu.CompilerParams(
          dimension_semantics=("parallel", "arbitrary"),
          vmem_limit_bytes=_vmem_limit(pass3_blocks)),
  )(tile_lo, tile_hi, dst_row, payload)

  return out_pad[:num_node]


# ----------------------------------------------------------------------------
# Pure-JAX reference for correctness checking.
# ----------------------------------------------------------------------------
def exphormer_reference(x, edge_index, edge_attr, params, *,
                        num_heads, head_dim):
  n = x.shape[0]
  hd = num_heads * head_dim
  q_h = (x @ params["Wq"] + params["bq"]).reshape(n, num_heads, head_dim)
  k_h = (x @ params["Wk"] + params["bk"]).reshape(n, num_heads, head_dim)
  v_h = (x @ params["Wv"] + params["bv"]).reshape(n, num_heads, head_dim)
  e_p = (edge_attr @ params["We"] + params["be"]).reshape(-1, num_heads,
                                                          head_dim)
  src, dst = edge_index[0], edge_index[1]
  score = (k_h[src] * q_h[dst]) / math.sqrt(head_dim) * e_p
  score = jnp.exp(jnp.clip(score.sum(-1, keepdims=True), -5.0, 5.0))
  msg = v_h[src] * score
  wv = jnp.zeros_like(v_h).at[dst].add(msg)
  z = jnp.zeros((n, num_heads, 1), jnp.float32).at[dst].add(score)
  return (wv / (z + 1e-6)).reshape(n, hd)


# ----------------------------------------------------------------------------
if __name__ == "__main__":
  # Small synthetic configuration; tiles chosen so all three grids have
  # multiple steps (pass2: 2 edge tiles, pass3: 2x2) to exercise the
  # accumulation, sorting and skip logic.
  N_NODES = 128
  IN_DIM = 64
  OUT_DIM = 128          # total hidden = num_heads * head_dim
  NUM_HEADS = 4
  HEAD_DIM = OUT_DIM // NUM_HEADS
  N_EDGES = 256

  key = jax.random.PRNGKey(0)
  keys = jax.random.split(key, 12)

  def linear_init(kw, kb, fan_in, fan_out):
    # PyTorch nn.Linear default init; weights stored as (fan_in, fan_out).
    bound = 1.0 / math.sqrt(fan_in)
    w = jax.random.uniform(kw, (fan_in, fan_out), jnp.float32, -bound, bound)
    b = jax.random.uniform(kb, (1, fan_out), jnp.float32, -bound, bound)
    return w, b

  Wq, bq = linear_init(keys[0], keys[1], IN_DIM, OUT_DIM)
  Wk, bk = linear_init(keys[2], keys[3], IN_DIM, OUT_DIM)
  We, be = linear_init(keys[4], keys[5], 1, OUT_DIM)
  Wv, bv = linear_init(keys[6], keys[7], IN_DIM, OUT_DIM)
  params = dict(Wq=Wq, bq=bq, Wk=Wk, bk=bk, We=We, be=be, Wv=Wv, bv=bv)

  x = jax.random.normal(keys[8], (N_NODES, IN_DIM), jnp.float32)
  edge_index = jax.random.randint(keys[9], (2, N_EDGES), 0, N_NODES, jnp.int32)
  edge_attr = jax.random.normal(keys[10], (N_EDGES, 1), jnp.float32)

  # Unused virtual-node inputs (use_virt_nodes=False, the module default).
  virt_h = jnp.zeros((1, IN_DIM), jnp.float32)
  virt_edge_index = jnp.zeros((2, 1), jnp.int32)
  virt_edge_attr = jnp.zeros((1, 1), jnp.float32)

  ref = exphormer_reference(x, edge_index, edge_attr, params,
                            num_heads=NUM_HEADS, head_dim=HEAD_DIM)

  run = functools.partial(
      exphormer_attention, x, edge_index, edge_attr,
      virt_h, virt_edge_index, virt_edge_attr, params,
      num_heads=NUM_HEADS, head_dim=HEAD_DIM,
      tile_nodes=64, tile_edges=128, proj_tile_nodes=128)

  # f32 path: gathers/scatters exact; tolerance covers the approx reciprocal.
  out_f32 = jax.block_until_ready(run(use_bf16_gather=False))
  np.testing.assert_allclose(np.asarray(out_f32), np.asarray(ref),
                             rtol=1e-2, atol=1e-4)

  # bf16 path (perf config): Q/K/V and payload are bf16-rounded before the
  # gather/scatter matmuls -> relaxed tolerance.
  out_bf16 = jax.block_until_ready(run(use_bf16_gather=True))
  np.testing.assert_allclose(np.asarray(out_bf16), np.asarray(ref),
                             rtol=4e-2, atol=1e-2)

  print("KERNEL_OK")
</pallas_src>

<mosaic_0001>
module attributes {stable_mosaic.version = 11 : i64} {
  func.func @_qkv_proj_kernel(%arg0: i32, %arg1: memref<128x64xf32, #tpu.memory_space<vmem>>, %arg2: memref<64x384xf32, #tpu.memory_space<vmem>>, %arg3: memref<1x384xf32, #tpu.memory_space<vmem>>, %arg4: memref<128x128xf32, #tpu.memory_space<vmem>>, %arg5: memref<128x256xf32, #tpu.memory_space<vmem>>) attributes {dimension_semantics = [#tpu.dimension_semantics<parallel>], iteration_bounds = array<i64: 1>, scalar_prefetch = 0 : i64, scratch_operands = 0 : i64, tpu.core_type = #tpu.core_type<tc>, window_params = [{transform_indices = @transform_0, window_bounds = array<i64: 128, 64>}, {pipeline_mode = #tpu.pipeline_mode<synchronous>, transform_indices = @transform_1, window_bounds = array<i64: 64, 384>}, {pipeline_mode = #tpu.pipeline_mode<synchronous>, transform_indices = @transform_2, window_bounds = array<i64: 1, 384>}, {transform_indices = @transform_3, window_bounds = array<i64: 128, 128>}, {transform_indices = @transform_4, window_bounds = array<i64: 128, 256>}]} {
    %c0 = arith.constant 0 : index
    %c0_0 = arith.constant 0 : index
    %0 = vector.load %arg1[%c0, %c0_0] : memref<128x64xf32, #tpu.memory_space<vmem>>, vector<128x64xf32>
    %c0_1 = arith.constant 0 : index
    %c0_2 = arith.constant 0 : index
    %1 = vector.load %arg2[%c0_1, %c0_2] : memref<64x384xf32, #tpu.memory_space<vmem>>, vector<64x384xf32>
    %cst = arith.constant dense<0.000000e+00> : vector<128x384xf32>
    %2 = tpu.matmul %0, %1, %cst {dimension_numbers = #tpu.dot_dimension_numbers<[1], [0], [0], [1], [0, 0, 1, 1], [], []>} : vector<128x64xf32>, vector<64x384xf32>, vector<128x384xf32> -> vector<128x384xf32>
    %c0_3 = arith.constant 0 : index
    %c0_4 = arith.constant 0 : index
    %3 = vector.load %arg3[%c0_3, %c0_4] : memref<1x384xf32, #tpu.memory_space<vmem>>, vector<1x384xf32>
    %4 = vector.broadcast %3 : vector<1x384xf32> to vector<128x384xf32>
    %5 = arith.addf %2, %4 : vector<128x384xf32>
    %6 = vector.extract_strided_slice %5 {offsets = [0, 0], sizes = [128, 128], strides = [1, 1]} : vector<128x384xf32> to vector<128x128xf32>
    %c0_5 = arith.constant 0 : index
    %c0_6 = arith.constant 0 : index
    %7 = vector.load %arg4[%c0_5, %c0_6] : memref<128x128xf32, #tpu.memory_space<vmem>>, vector<128x128xf32>
    tpu.vector_store %arg4[%c0_5, %c0_6], %6 {strides = array<i32>} : memref<128x128xf32, #tpu.memory_space<vmem>>, vector<128x128xf32>,
    %8 = vector.extract_strided_slice %5 {offsets = [0, 128], sizes = [128, 256], strides = [1, 1]} : vector<128x384xf32> to vector<128x256xf32>
    %c0_7 = arith.constant 0 : index
    %c0_8 = arith.constant 0 : index
    %9 = vector.load %arg5[%c0_7, %c0_8] : memref<128x256xf32, #tpu.memory_space<vmem>>, vector<128x256xf32>
    tpu.vector_store %arg5[%c0_7, %c0_8], %8 {strides = array<i32>} : memref<128x256xf32, #tpu.memory_space<vmem>>, vector<128x256xf32>,
    return
  }
  func.func @transform_0(%arg0: i32) -> (i32, i32) {
    %c0_i32 = arith.constant 0 : i32
    %c0_i32_0 = arith.constant 0 : i32
    return %arg0, %c0_i32 : i32, i32
  }
  func.func @transform_1(%arg0: i32) -> (i32, i32) {
    %c0_i32 = arith.constant 0 : i32
    %c0_i32_0 = arith.constant 0 : i32
    %c0_i32_1 = arith.constant 0 : i32
    return %c0_i32, %c0_i32_0 : i32, i32
  }
  func.func @transform_2(%arg0: i32) -> (i32, i32) {
    %c0_i32 = arith.constant 0 : i32
    %c0_i32_0 = arith.constant 0 : i32
    %c0_i32_1 = arith.constant 0 : i32
    return %c0_i32, %c0_i32_0 : i32, i32
  }
  func.func @transform_3(%arg0: i32) -> (i32, i32) {
    %c0_i32 = arith.constant 0 : i32
    %c0_i32_0 = arith.constant 0 : i32
    return %arg0, %c0_i32 : i32, i32
  }
  func.func @transform_4(%arg0: i32) -> (i32, i32) {
    %c0_i32 = arith.constant 0 : i32
    %c0_i32_0 = arith.constant 0 : i32
    return %arg0, %c0_i32 : i32, i32
  }
}

</mosaic_0001>

<bundles_post_ra>
// kernel: tpu_custom_call.1
= control target key start
LH: loop header
LB: loop body
LE: loop exit
PB: predicated region body
PF: predicated region fallthrough
CT: control target
= control target key end

     0   :  { %10 = vsyncpa [#allocation3], 0  ;;  %v701_v7 = vmov 0.0   ;;  %s1000_s0 = inlined_call_operand.vmem [shape: f32[128,64], index: 0, kind: input, shape index: {}]   ;;  %s1001_s1 = inlined_call_operand.vmem [shape: f32[64,384], index: 1, kind: input, shape index: {}]   ;;  %s1002_s2 = inlined_call_operand.vmem [shape: f32[1,384], index: 2, kind: input, shape index: {}]   ;;  %s1003_s3 = inlined_call_operand.hbm [shape: f32[128,128], index: 3, kind: output, shape index: {0}]   ;;  %s1004_s4 = inlined_call_operand.hbm [shape: f32[128,256], index: 4, kind: output, shape index: {1}]  }
   0x1   :  { %v35_v0 = vld [vmem:[%s1001_s1 + $0x8] sm:$0xff]  ;;  %v38_v1 = vld [vmem:[%s1001_s1 + $0x20] sm:$0xff]  ;;  %v37_v4 = vld [vmem:[%s1001_s1 + $0x18] sm:$0xff]  ;;  %188 = vmatprep.mubr.f32.mxu0 %v701_v7  ;;  %260 = vmatprep.mubr.f32.mxu1 %v701_v7 }
   0x2   :  { %v34_v2 = vld [vmem:[%s1001_s1] sm:$0xff]  ;;  %v606_v3 = vpack.c.bf16 %v38_v1, %v35_v0  ;;  %v41_v5 = vld [vmem:[%s1001_s1 + $0x38] sm:$0xff]  ;;  %v44_v6 = vld [vmem:[%s1001_s1 + $0x50] sm:$0xff] }
   0x3   :  { %v608_v8 = vpack.c.bf16 %v37_v4, %v34_v2  ;;  %v610_v9 = vpack.c.bf16 %v44_v6, %v41_v5  ;;  %v40_v10 = vld [vmem:[%s1001_s1 + $0x30] sm:$0xff]  ;;  %v43_v11 = vld [vmem:[%s1001_s1 + $0x48] sm:$0xff]  ;;  %v50_v13 = vld [vmem:[%s1001_s1 + $0x80] sm:$0xff] }
   0x4   :  { %v47_v12 = vld [vmem:[%s1001_s1 + $0x68] sm:$0xff]  ;;  %607 = vmatprep.subr.bf16.mxu0 %v606_v3  ;;  %638 = vmatprep.subr.bf16.mxu1 %v606_v3  ;;  %v612_v14 = vpack.c.bf16 %v43_v11, %v40_v10  ;;  %v46_v16 = vld [vmem:[%s1001_s1 + $0x60] sm:$0xff]  ;;  %v49_v17 = vld [vmem:[%s1001_s1 + $0x78] sm:$0xff] }
   0x5   :  { %609 = vmatpush1.bf16.msra.mxu0 %v608_v8  ;;  %642 = vmatpush1.bf16.msra.mxu1 %v608_v8  ;;  %v614_v15 = vpack.c.bf16 %v50_v13, %v47_v12  ;;  %v53_v18 = vld [vmem:[%s1001_s1 + $0x98] sm:$0xff]  ;;  %v56_v19 = vld [vmem:[%s1001_s1 + $0xb0] sm:$0xff]  ;;  %v616_v20 = vpack.c.bf16 %v49_v17, %v46_v16  ;;  %v55_v23 = vld [vmem:[%s1001_s1 + $0xa8] sm:$0xff] }
   0x6   :  { %611 = vmatprep.subr.bf16.mxu0 %v610_v9  ;;  %639 = vmatprep.subr.bf16.mxu1 %v610_v9  ;;  %v618_v21 = vpack.c.bf16 %v56_v19, %v53_v18  ;;  %v52_v22 = vld [vmem:[%s1001_s1 + $0x90] sm:$0xff]  ;;  %v39_v25 = vld [vmem:[%s1001_s1 + $0x28] sm:$0xff] }
   0x7   :  { %v36_v24 = vld [vmem:[%s1001_s1 + $0x10] sm:$0xff]  ;;  %v620_v26 = vpack.c.bf16 %v55_v23, %v52_v22 }
   0x8   :  { %v622_v27 = vpack.c.bf16 %v39_v25, %v36_v24 }
   0x9   :  { %613 = vmatpush1.bf16.msra.mxu0 %v612_v14  ;;  %643 = vmatpush1.bf16.msra.mxu1 %v612_v14 }
   0xa   :  { %615 = vmatprep.subr.bf16.mxu0 %v614_v15  ;;  %640 = vmatprep.subr.bf16.mxu1 %v614_v15 }
   0xd   :  { %617 = vmatpush1.bf16.msra.mxu0 %v616_v20  ;;  %644 = vmatpush1.bf16.msra.mxu1 %v616_v20 }
   0xe   :  { %619 = vmatprep.subr.bf16.mxu0 %v618_v21  ;;  %641 = vmatprep.subr.bf16.mxu1 %v618_v21 }
   0xf   :  { %11 = vsyncpa [#allocation5], 0  ;;  %v42_v28 = vld [vmem:[%s1001_s1 + $0x40] sm:$0xff]  ;;  %v45_v29 = vld [vmem:[%s1001_s1 + $0x58] sm:$0xff]  ;;  %vm75_vm0 = vcmask 523264   ;;  %v60_v53 = vlaneseq  ;;  %s703_s18 = smov [#allocation4]  }
  0x10   :  { %v18_v30 = vld [vmem:[%s1000_s0] sm:$0xff]  ;;  %v626_v32 = vpack.c.bf16 %v45_v29, %v42_v28  ;;  %v48_v33 = vld [vmem:[%s1001_s1 + $0x70] sm:$0xff]  ;;  %v51_v34 = vld [vmem:[%s1001_s1 + $0x88] sm:$0xff]  ;;  %s495_s19 = sshll.u32 %s703_s18, 4  ;;  %s962_s19 = int_to_ptr.vmem [resolvable:$true] %s495_s19 }
  0x11   :  { %621 = vmatpush1.bf16.msra.mxu0 %v620_v26  ;;  %645 = vmatpush1.bf16.msra.mxu1 %v620_v26  ;;  %v801_v31 = vld [vmem:[%s1000_s0 + $0x60] sm:$0xff]  ;;  %v19_v35 = vld [vmem:[%s1000_s0 + $0x8] sm:$0xff]  ;;  %v630_v37 = vpack.c.bf16 %v51_v34, %v48_v33  ;;  %v57_v39 = vld [vmem:[%s1001_s1 + $0xb8] sm:$0xff]  ;;  %v61_v54 = vshrl.u32 %v60_v53, 7 }
  0x12   :  { %623 = vmatprep.subr.bf16.mxu1 %v622_v27  ;;  %v31_v36 = vld [vmem:[%s1000_s0 + $0x68] sm:$0xff]  ;;  %v54_v38 = vld [vmem:[%s1001_s1 + $0xa0] sm:$0xff]  ;;  %v20_v40 = vld [vmem:[%s1000_s0 + $0x10] sm:$0xff] }
  0x13   :  { %v32_v41 = vld [vmem:[%s1000_s0 + $0x70] sm:$0xff]  ;;  %v634_v42 = vpack.c.bf16 %v57_v39, %v54_v38  ;;  %v21_v43 = vld [vmem:[%s1000_s0 + $0x18] sm:$0xff]  ;;  %v22_v45 = vld [vmem:[%s1000_s0 + $0x20] sm:$0xff]  ;;  %v62_v55 = vsub.s32 0, %v61_v54  ;;  %v66_v57 = vsub.s32 1, %v61_v54  ;;  %v70_v18 = vsub.s32 2, %v61_v54 }
  0x14   :  { %510 = vmatmul.mubr.msk.f32.vlgmr.msra.gmra.mrb[0].mxu0 %vm75_vm0, %v18_v30  ;;  %522 = vmatmul.mubr.msk.f32.vlgmr.msra.gmra.mrb[0].mxu1 %vm75_vm0, %v801_v31  ;;  %v33_v44 = vld [vmem:[%s1000_s0 + $0x78] sm:$0xff]  ;;  %v23_v46 = vld [vmem:[%s1000_s0 + $0x28] sm:$0xff]  ;;  %v24_v47 = vld [vmem:[%s1000_s0 + $0x30] sm:$0xff] }
  0x15   :  { %625 = vmatpush3.bf16.msra.mxu1 %v622_v27  ;;  %194 = vmatprep.mubr.f32.mxu0 %v701_v7  ;;  %v25_v48 = vld [vmem:[%s1000_s0 + $0x38] sm:$0xff]  ;;  %v26_v49 = vld [vmem:[%s1000_s0 + $0x40] sm:$0xff]  ;;  %v27_v50 = vld [vmem:[%s1000_s0 + $0x48] sm:$0xff] }
  0x16   :  { %266 = vmatprep.mubr.f32.mxu1 %v701_v7  ;;  %627 = vmatprep.subr.bf16.mxu1 %v626_v32  ;;  %v28_v51 = vld [vmem:[%s1000_s0 + $0x50] sm:$0xff]  ;;  %v29_v52 = vld [vmem:[%s1000_s0 + $0x58] sm:$0xff]  ;;  %v58_v56 = vld [vmem:[%s1002_s2] sm:$0x7]  ;;  %s702_s2 = smov [#allocation2]  }
  0x17   :  { %v908_v58 = vrot.slane %v58_v56, %v62_v55  ;;  %v910_v59 = vrot.slane %v58_v56, %v66_v57  ;;  %v926_v27 = vrot.slane %v58_v56, %v70_v18  ;;  %s483_s17 = sshll.u32 %s702_s2, 4  ;;  %s958_s17 = int_to_ptr.vmem [resolvable:$true] %s483_s17 }
  0x18   :  { %511 = vmatmul.mubr.msk.f32.gmra.mrb[2].mxu0 %vm75_vm0, %v19_v35  ;;  %523 = vmatmul.mubr.msk.f32.gmra.mrb[2].mxu1 %vm75_vm0, %v31_v36  ;;  %s653_s20 = scalar_lea.vmem %s958_s17, 2048  ;;  %p658_p1 = scmp.lt.s32.totalorder %s958_s17, %s958_s17 }
  0x19   :  { %629 = vmatpush3.bf16.msra.mxu1 %v626_v32  ;;  %200 = vmatprep.mubr.f32.mxu0 %v701_v7  ;;  %p654_p0 = scmp.ne.s32.totalorder %s958_s17, %s653_s20  ;;  %p659_p2 = scmp.lt.s32.totalorder %s653_s20, %s653_s20 }
  0x1a   :  { %272 = vmatprep.mubr.f32.mxu1 %v701_v7  ;;  %631 = vmatprep.subr.bf16.mxu1 %v630_v37 }
  0x1b   :  { %p660_p3 = por %p659_p2, %p658_p1 }
  0x1c   :  { %512 = vmatmul.mubr.msk.f32.gmra.mrb[4].mxu0 %vm75_vm0, %v20_v40  ;;  %524 = vmatmul.mubr.msk.f32.gmra.mrb[4].mxu1 %vm75_vm0, %v32_v41 }
  0x1d   :  { %633 = vmatpush3.bf16.msra.mxu1 %v630_v37  ;;  %206 = vmatprep.mubr.f32.mxu0 %v701_v7  ;;  %p661_p4 = pnand %p660_p3, %p654_p0 }
  0x1e   :  { %278 = vmatprep.mubr.f32.mxu1 %v701_v7  ;;  %635 = vmatprep.subr.bf16.mxu1 %v634_v42 }
  0x20   :  { %513 = vmatmul.mubr.msk.f32.gmra.mrb[6].mxu0 %vm75_vm0, %v21_v43  ;;  %525 = vmatmul.mubr.msk.f32.gmra.mrb[6].mxu1 %vm75_vm0, %v33_v44 }
  0x21   :  { %637 = vmatpush3.bf16.msra.mxu1 %v634_v42  ;;  %212 = vmatprep.mubr.f32.mxu0 %v701_v7 }
  0x22   :  { %582 = vmatprep.mubr.msk.f32.mxu1 %vm75_vm0, %v18_v30 }
  0x24   :  { %514 = vmatmul.mubr.msk.f32.gmra.mrb[8].mxu0 %vm75_vm0, %v22_v45  ;;  %583 = vmatmul.mubr.msk.f32.vlgmr.msra.gmra.mrb[8].mxu1 %vm75_vm0, %v19_v35 }
  0x25   :  { %218 = vmatprep.mubr.f32.mxu0 %v701_v7  ;;  %585 = vmatprep.mubr.msk.f32.mxu1 %vm75_vm0, %v20_v40 }
  0x28   :  { %515 = vmatmul.mubr.msk.f32.gmra.mrb[10].mxu0 %vm75_vm0, %v23_v46  ;;  %586 = vmatmul.mubr.msk.f32.gmra.mrb[10].mxu1 %vm75_vm0, %v21_v43 }
  0x29   :  { %224 = vmatprep.mubr.f32.mxu0 %v701_v7  ;;  %588 = vmatprep.mubr.msk.f32.mxu1 %vm75_vm0, %v22_v45 }
  0x2c   :  { %516 = vmatmul.mubr.msk.f32.gmra.mrb[12].mxu0 %vm75_vm0, %v24_v47  ;;  %589 = vmatmul.mubr.msk.f32.gmra.mrb[12].mxu1 %vm75_vm0, %v23_v46 }
  0x2d   :  { %230 = vmatprep.mubr.f32.mxu0 %v701_v7  ;;  %591 = vmatprep.mubr.msk.f32.mxu1 %vm75_vm0, %v24_v47 }
  0x30   :  { %517 = vmatmul.mubr.msk.f32.gmra.mrb[14].mxu0 %vm75_vm0, %v25_v48  ;;  %592 = vmatmul.mubr.msk.f32.gmra.mrb[14].mxu1 %vm75_vm0, %v25_v48 }
  0x31   :  { %236 = vmatprep.mubr.f32.mxu0 %v701_v7  ;;  %594 = vmatprep.mubr.msk.f32.mxu1 %vm75_vm0, %v26_v49 }
  0x34   :  { %518 = vmatmul.mubr.msk.f32.gmra.mrb[16].mxu0 %vm75_vm0, %v26_v49  ;;  %595 = vmatmul.mubr.msk.f32.gmra.mrb[16].mxu1 %vm75_vm0, %v27_v50 }
  0x35   :  { %242 = vmatprep.mubr.f32.mxu0 %v701_v7  ;;  %597 = vmatprep.mubr.msk.f32.mxu1 %vm75_vm0, %v28_v51 }
  0x38   :  { %519 = vmatmul.mubr.msk.f32.gmra.mrb[18].mxu0 %vm75_vm0, %v27_v50  ;;  %598 = vmatmul.mubr.msk.f32.gmra.mrb[18].mxu1 %vm75_vm0, %v29_v52 }
  0x39   :  { %248 = vmatprep.mubr.f32.mxu0 %v701_v7  ;;  %600 = vmatprep.mubr.msk.f32.mxu1 %vm75_vm0, %v801_v31 }
  0x3c   :  { %520 = vmatmul.mubr.msk.f32.gmra.mrb[20].mxu0 %vm75_vm0, %v28_v51  ;;  %601 = vmatmul.mubr.msk.f32.gmra.mrb[20].mxu1 %vm75_vm0, %v31_v36 }
  0x3d   :  { %254 = vmatprep.mubr.f32.mxu0 %v701_v7  ;;  %603 = vmatprep.mubr.msk.f32.mxu1 %vm75_vm0, %v32_v41 }
  0x40   :  { %521 = vmatmul.mubr.msk.f32.gmra.mrb[22].mxu0 %vm75_vm0, %v29_v52  ;;  %604 = vmatmul.mubr.msk.f32.gmra.mrb[22].mxu1 %vm75_vm0, %v33_v44 }
  0xe7   :  { %v190_v60 = vpop.f32.mrb[0].mxu0  ;;  %v262_v61 = vpop.f32.mrb[0].mxu1 }
  0xe8   :  { %v191_v62 = vadd.f32 %v190_v60, %v908_v58  ;;  %v263_v63 = vadd.f32 %v262_v61, %v908_v58  ;;  %v192_v0 = vpop.f32.mrb[1].mxu0  ;;  %v264_v1 = vpop.f32.mrb[1].mxu1 }
  0xe9   :  { %v193_v2 = vadd.f32 %v192_v0, %v910_v59  ;;  %v265_v3 = vadd.f32 %v264_v1, %v910_v59 }
  0xea   :  { %430 = vst [vmem:[#allocation2] sm:$0xff] %v191_v62  ;;  %442 = vst [vmem:[#allocation2 + $0x60] sm:$0xff] %v263_v63 }
  0xeb   :  { %446 = vst [vmem:[#allocation4] sm:$0xff] %v193_v2  ;;  %470 = vst [vmem:[#allocation4 + $0xc0] sm:$0xff] %v265_v3  ;;  %v196_v4 = vpop.f32.mrb[2].mxu0  ;;  %v268_v5 = vpop.f32.mrb[2].mxu1 }
  0xec   :  { %v197_v6 = vadd.f32 %v196_v4, %v908_v58  ;;  %v269_v7 = vadd.f32 %v268_v5, %v908_v58  ;;  %v198_v8 = vpop.f32.mrb[3].mxu0  ;;  %v270_v9 = vpop.f32.mrb[3].mxu1 }
  0xed   :  { %v199_v10 = vadd.f32 %v198_v8, %v910_v59  ;;  %v271_v11 = vadd.f32 %v270_v9, %v910_v59 }
  0xee   :  { %431 = vst [vmem:[#allocation2 + $0x8] sm:$0xff] %v197_v6  ;;  %443 = vst [vmem:[#allocation2 + $0x68] sm:$0xff] %v269_v7 }
  0xef   :  { %448 = vst [vmem:[#allocation4 + $0x10] sm:$0xff] %v199_v10  ;;  %472 = vst [vmem:[#allocation4 + $0xd0] sm:$0xff] %v271_v11  ;;  %v202_v12 = vpop.f32.mrb[4].mxu0  ;;  %v274_v13 = vpop.f32.mrb[4].mxu1 }
  0xf0   :  { %v203_v14 = vadd.f32 %v202_v12, %v908_v58  ;;  %v275_v15 = vadd.f32 %v274_v13, %v908_v58  ;;  %v204_v16 = vpop.f32.mrb[5].mxu0  ;;  %v276_v17 = vpop.f32.mrb[5].mxu1 }
  0xf1   :  { %v205_v19 = vadd.f32 %v204_v16, %v910_v59  ;;  %v277_v20 = vadd.f32 %v276_v17, %v910_v59 }
  0xf2   :  { %432 = vst [vmem:[#allocation2 + $0x10] sm:$0xff] %v203_v14  ;;  %444 = vst [vmem:[#allocation2 + $0x70] sm:$0xff] %v275_v15 }
  0xf3   :  { %450 = vst [vmem:[#allocation4 + $0x20] sm:$0xff] %v205_v19  ;;  %474 = vst [vmem:[#allocation4 + $0xe0] sm:$0xff] %v277_v20  ;;  %v208_v21 = vpop.f32.mrb[6].mxu0  ;;  %v280_v22 = vpop.f32.mrb[6].mxu1 }
  0xf4   :  { %v209_v23 = vadd.f32 %v208_v21, %v908_v58  ;;  %v281_v24 = vadd.f32 %v280_v22, %v908_v58  ;;  %v210_v25 = vpop.f32.mrb[7].mxu0  ;;  %v282_v26 = vpop.f32.mrb[7].mxu1 }
  0xf5   :  { %v211_v28 = vadd.f32 %v210_v25, %v910_v59  ;;  %v283_v29 = vadd.f32 %v282_v26, %v910_v59 }
  0xf6   :  { %433 = vst [vmem:[#allocation2 + $0x18] sm:$0xff] %v209_v23  ;;  %445 = vst [vmem:[#allocation2 + $0x78] sm:$0xff] %v281_v24 }
  0xf7   :  { %452 = vst [vmem:[#allocation4 + $0x30] sm:$0xff] %v211_v28  ;;  %476 = vst [vmem:[#allocation4 + $0xf0] sm:$0xff] %v283_v29  ;;  %v214_v30 = vpop.f32.mrb[8].mxu0  ;;  %v584_v31 = vpop.f32.mrb[8].mxu1 }
  0xf8   :  { %v215_v32 = vadd.f32 %v214_v30, %v908_v58  ;;  %v357_v33 = vadd.f32 %v584_v31, %v926_v27  ;;  %v216_v34 = vpop.f32.mrb[9].mxu0  ;;  %v351_v35 = vpop.f32.mrb[9].mxu1 }
  0xf9   :  { %v217_v36 = vadd.f32 %v216_v34, %v910_v59  ;;  %v352_v37 = vadd.f32 %v351_v35, %v926_v27 }
  0xfa   :  { %434 = vst [vmem:[#allocation2 + $0x20] sm:$0xff] %v215_v32  ;;  %449 = vst [vmem:[#allocation4 + $0x18] sm:$0xff] %v357_v33 }
  0xfb   :  { %454 = vst [vmem:[#allocation4 + $0x40] sm:$0xff] %v217_v36  ;;  %447 = vst [vmem:[#allocation4 + $0x8] sm:$0xff] %v352_v37  ;;  %v220_v38 = vpop.f32.mrb[10].mxu0  ;;  %v587_v39 = vpop.f32.mrb[10].mxu1 }
  0xfc   :  { %v221_v40 = vadd.f32 %v220_v38, %v908_v58  ;;  %v367_v41 = vadd.f32 %v587_v39, %v926_v27  ;;  %v222_v42 = vpop.f32.mrb[11].mxu0  ;;  %v361_v43 = vpop.f32.mrb[11].mxu1 }
  0xfd   :  { %v223_v44 = vadd.f32 %v222_v42, %v910_v59  ;;  %v362_v45 = vadd.f32 %v361_v43, %v926_v27 }
  0xfe   :  { %435 = vst [vmem:[#allocation2 + $0x28] sm:$0xff] %v221_v40  ;;  %453 = vst [vmem:[#allocation4 + $0x38] sm:$0xff] %v367_v41 }
  0xff   :  { %456 = vst [vmem:[#allocation4 + $0x50] sm:$0xff] %v223_v44  ;;  %451 = vst [vmem:[#allocation4 + $0x28] sm:$0xff] %v362_v45  ;;  %v226_v46 = vpop.f32.mrb[12].mxu0  ;;  %v590_v47 = vpop.f32.mrb[12].mxu1 }
 0x100   :  { %v227_v48 = vadd.f32 %v226_v46, %v908_v58  ;;  %v377_v49 = vadd.f32 %v590_v47, %v926_v27  ;;  %v228_v50 = vpop.f32.mrb[13].mxu0  ;;  %v371_v51 = vpop.f32.mrb[13].mxu1 }
 0x101   :  { %v229_v52 = vadd.f32 %v228_v50, %v910_v59  ;;  %v372_v53 = vadd.f32 %v371_v51, %v926_v27 }
 0x102   :  { %436 = vst [vmem:[#allocation2 + $0x30] sm:$0xff] %v227_v48  ;;  %457 = vst [vmem:[#allocation4 + $0x58] sm:$0xff] %v377_v49 }
 0x103   :  { %458 = vst [vmem:[#allocation4 + $0x60] sm:$0xff] %v229_v52  ;;  %455 = vst [vmem:[#allocation4 + $0x48] sm:$0xff] %v372_v53  ;;  %v232_v54 = vpop.f32.mrb[14].mxu0  ;;  %v593_v55 = vpop.f32.mrb[14].mxu1 }
 0x104   :  { %v233_v56 = vadd.f32 %v232_v54, %v908_v58  ;;  %v387_v57 = vadd.f32 %v593_v55, %v926_v27  ;;  %v234_v60 = vpop.f32.mrb[15].mxu0  ;;  %v381_v61 = vpop.f32.mrb[15].mxu1 }
 0x105   :  { %v235_v62 = vadd.f32 %v234_v60, %v910_v59  ;;  %v382_v63 = vadd.f32 %v381_v61, %v926_v27 }
 0x106   :  { %437 = vst [vmem:[#allocation2 + $0x38] sm:$0xff] %v233_v56  ;;  %461 = vst [vmem:[#allocation4 + $0x78] sm:$0xff] %v387_v57 }
 0x107   :  { %460 = vst [vmem:[#allocation4 + $0x70] sm:$0xff] %v235_v62  ;;  %459 = vst [vmem:[#allocation4 + $0x68] sm:$0xff] %v382_v63  ;;  %v238_v0 = vpop.f32.mrb[16].mxu0  ;;  %v596_v1 = vpop.f32.mrb[16].mxu1 }
 0x108   :  { %v239_v2 = vadd.f32 %v238_v0, %v908_v58  ;;  %v397_v3 = vadd.f32 %v596_v1, %v926_v27  ;;  %v240_v4 = vpop.f32.mrb[17].mxu0  ;;  %v391_v5 = vpop.f32.mrb[17].mxu1 }
 0x109   :  { %v241_v6 = vadd.f32 %v240_v4, %v910_v59  ;;  %v392_v7 = vadd.f32 %v391_v5, %v926_v27 }
 0x10a   :  { %438 = vst [vmem:[#allocation2 + $0x40] sm:$0xff] %v239_v2  ;;  %465 = vst [vmem:[#allocation4 + $0x98] sm:$0xff] %v397_v3 }
 0x10b   :  { %462 = vst [vmem:[#allocation4 + $0x80] sm:$0xff] %v241_v6  ;;  %463 = vst [vmem:[#allocation4 + $0x88] sm:$0xff] %v392_v7  ;;  %v244_v8 = vpop.f32.mrb[18].mxu0  ;;  %v599_v9 = vpop.f32.mrb[18].mxu1 }
 0x10c   :  { %v245_v10 = vadd.f32 %v244_v8, %v908_v58  ;;  %v407_v11 = vadd.f32 %v599_v9, %v926_v27  ;;  %v246_v12 = vpop.f32.mrb[19].mxu0  ;;  %v401_v13 = vpop.f32.mrb[19].mxu1 }
 0x10d   :  { %v247_v14 = vadd.f32 %v246_v12, %v910_v59  ;;  %v402_v15 = vadd.f32 %v401_v13, %v926_v27 }
 0x10e   :  { %439 = vst [vmem:[#allocation2 + $0x48] sm:$0xff] %v245_v10  ;;  %469 = vst [vmem:[#allocation4 + $0xb8] sm:$0xff] %v407_v11 }
 0x10f   :  { %464 = vst [vmem:[#allocation4 + $0x90] sm:$0xff] %v247_v14  ;;  %467 = vst [vmem:[#allocation4 + $0xa8] sm:$0xff] %v402_v15  ;;  %v250_v16 = vpop.f32.mrb[20].mxu0  ;;  %v602_v17 = vpop.f32.mrb[20].mxu1 }
 0x110   :  { %v251_v18 = vadd.f32 %v250_v16, %v908_v58  ;;  %v417_v19 = vadd.f32 %v602_v17, %v926_v27  ;;  %v252_v20 = vpop.f32.mrb[21].mxu0  ;;  %v411_v21 = vpop.f32.mrb[21].mxu1 }
 0x111   :  { %v253_v22 = vadd.f32 %v252_v20, %v910_v59  ;;  %v412_v23 = vadd.f32 %v411_v21, %v926_v27 }
 0x112   :  { %440 = vst [vmem:[#allocation2 + $0x50] sm:$0xff] %v251_v18  ;;  %473 = vst [vmem:[#allocation4 + $0xd8] sm:$0xff] %v417_v19 }
 0x113   :  { %466 = vst [vmem:[#allocation4 + $0xa0] sm:$0xff] %v253_v22  ;;  %471 = vst [vmem:[#allocation4 + $0xc8] sm:$0xff] %v412_v23  ;;  %v256_v24 = vpop.f32.mrb[22].mxu0  ;;  %v605_v25 = vpop.f32.mrb[22].mxu1 }
 0x114   :  { %v257_v26 = vadd.f32 %v256_v24, %v908_v58  ;;  %v427_v28 = vadd.f32 %v605_v25, %v926_v27  ;;  %v258_v29 = vpop.f32.mrb[23].mxu0  ;;  %v421_v30 = vpop.f32.mrb[23].mxu1 }
 0x115   :  { %v259_v31 = vadd.f32 %v258_v29, %v910_v59  ;;  %v422_v32 = vadd.f32 %v421_v30, %v926_v27 }
 0x116   :  { %441 = vst [vmem:[#allocation2 + $0x58] sm:$0xff] %v257_v26  ;;  %477 = vst [vmem:[#allocation4 + $0xf8] sm:$0xff] %v427_v28 }
 0x117   :  { %468 = vst [vmem:[#allocation4 + $0xb0] sm:$0xff] %v259_v31  ;;  %475 = vst [vmem:[#allocation4 + $0xe8] sm:$0xff] %v422_v32 }
 0x118   :  { %664 = shalt.err (!%p661_p4)
}
 0x119   :  { %s665_s1 = scalar_lea.hbm %s1003_s3, 2048 }
 0x11a   :  { %p666_p5 = scmp.ne.s32.totalorder %s1003_s3, %s665_s1  ;;  %p669_p6 = scmp.lt.u32.totalorder %s665_s1, %s1003_s3 }
 0x11c   :  { %p671_p7 = pnand %p669_p6, %p666_p5 }
 0x11e   :  { %674 = shalt.err (!%p671_p7)
}
 0x11f   :  { %s704_s27 = smov 128   ;;  %s705_s28 = smov 8  }
 0x120   :  { %489 = dma.vmem_to_hbm [thread:$0]  %s958_s17, 2048, %s1003_s3, [#allocation3], %s704_s27, %s704_s27, %s705_s28  }
 0x121   :  { %s675_s5 = scalar_lea.vmem %s962_s19, 4096  ;;  %p680_p9 = scmp.lt.s32.totalorder %s962_s19, %s962_s19 }
 0x122   :  { %p676_p8 = scmp.ne.s32.totalorder %s962_s19, %s675_s5  ;;  %p681_p10 = scmp.lt.s32.totalorder %s675_s5, %s675_s5 }
 0x124   :  { %p682_p11 = por %p681_p10, %p680_p9 }
 0x126   :  { %p683_p12 = pnand %p682_p11, %p676_p8 }
 0x128   :  { %686 = shalt.err (!%p683_p12)
}
 0x129   :  { %s687_s8 = scalar_lea.hbm %s1004_s4, 4096 }
 0x12a   :  { %p688_p13 = scmp.ne.s32.totalorder %s1004_s4, %s687_s8  ;;  %p691_p0 = scmp.lt.u32.totalorder %s687_s8, %s1004_s4 }
 0x12c   :  { %p693_p1 = pnand %p691_p0, %p688_p13 }
 0x12e   :  { %696 = shalt.err (!%p693_p1)
}
 0x12f   :  { %s706_s3 = smov 256   ;;  %s707_s13 = smov 16  }
 0x130   :  { %501 = dma.vmem_to_hbm [thread:$0]  %s962_s19, 4096, %s1004_s4, [#allocation5], %s706_s3, %s706_s3, %s707_s13  }
 0x131   :  { %697 = dma.done.wait [#allocation3], 2048  }
 0x132   :  { %698 = vsyncadd [#allocation3], 4294965248 }
 0x133   :  { %699 = dma.done.wait [#allocation5], 4096  }
 0x134   :  { %700 = vsyncadd [#allocation5], 4294963200 }
 0x135   :  { %508 = vsyncpa [#allocation3], 1 }
 0x136   :  { %509 = vsyncpa [#allocation5], 1 }

</bundles_post_ra>
